<compile_context>
chip_gen: v6e
topology: v6e:2x2x1
jax: 0.10.0
libtpu: 0.0.40
codegen_flags: <defaults>
</compile_context>

<pallas_src>
import functools

import jax
import jax.numpy as jnp
from jax import lax
from jax.experimental import pallas as pl
from jax.experimental.pallas import tpu as pltpu


# VMEM budget used for tile selection (conservative: everything counted double-buffered).
# 40 MiB fits comfortably inside v7x's 64 MiB physical VMEM and v5e/v6e's 128 MiB.
_VMEM_BUDGET = 40 * 1024 * 1024
_VMEM_LIMIT_BYTES = 48 * 1024 * 1024


def _round_up(n: int, m: int) -> int:
    return ((n + m - 1) // m) * m


def _cdiv(a: int, b: int) -> int:
    return -(-a // b)


def _dtype_bytes(dt) -> int:
    return jnp.dtype(dt).itemsize


def _linear_kernel(x_ref, w_ref, b_ref, o_ref):
    # x_ref: [TB, TK]     w_ref: [Cpad, TK] (PyTorch [C, D] layout, contract last dims)
    # b_ref: [1, Cpad]    o_ref: [TB, Cpad] float32 (used directly as the accumulator)
    k = pl.program_id(1)

    @pl.when(k == 0)
    def _():
        # Initialise the resident output block with the bias -> no epilogue pass needed.
        o_ref[...] = jnp.broadcast_to(b_ref[...].astype(jnp.float32), o_ref.shape)

    xv = x_ref[...]
    if xv.dtype != w_ref.dtype:          # trace-time branch (e.g. f32 x with bf16 weight)
        xv = xv.astype(w_ref.dtype)

    # x @ W^T without materializing W^T; f32 MXU accumulate.
    o_ref[...] += lax.dot_general(
        xv,
        w_ref[...],
        dimension_numbers=(((1,), (1,)), ((), ())),
        preferred_element_type=jnp.float32,
    )


def prepare_params(weight, bias, *, compute_dtype=jnp.float32, tk_max: int = 512):
    """One-time parameter prep (hoisted out of the per-call path).

    weight: [C, D] (PyTorch nn.Linear layout), bias: [C].
    Returns (w_padded [Cpad, Dpad], b_padded [1, Cpad], tk).
    tk == Dpad == D  => no K-tiling, weight fully VMEM-resident (common case).
    Zero padding keeps the matmul numerically exact; extra output columns are sliced off.
    """
    C, D = weight.shape
    c_pad = _round_up(max(C, 1), 128)
    wbytes = _dtype_bytes(compute_dtype)

    # Can the whole weight live in VMEM alongside a minimal (64-row) x tile + output tile?
    resident_need = (2 * c_pad * D * wbytes          # weight (counted double-buffered)
                     + 2 * 64 * D * wbytes           # x tile
                     + 2 * 64 * c_pad * 4            # f32 output tile
                     + 2 * c_pad * 4)                # bias
    if resident_need <= _VMEM_BUDGET:
        tk, d_pad = D, D                             # single K step, weight resident
    else:
        tk = min(tk_max, _round_up(D, 128))
        d_pad = _round_up(D, tk)

    w_p = (jnp.zeros((c_pad, d_pad), compute_dtype)
           .at[:C, :D].set(weight.astype(compute_dtype)))
    b_p = jnp.zeros((1, c_pad), jnp.float32).at[0, :C].set(bias.astype(jnp.float32))
    return w_p, b_p, tk


def _pick_tb(B: int, tk: int, c_pad: int, x_bytes: int, w_bytes: int, tb_max: int) -> int:
    """Largest multiple-of-8 batch tile that fits the VMEM budget (double-buffered)."""
    fixed = 2 * c_pad * tk * w_bytes + 2 * c_pad * 4           # weight chunk + bias
    per_row = 2 * tk * x_bytes + 2 * c_pad * 4                 # x tile row + f32 out row
    tb_fit = max(8, ((_VMEM_BUDGET - fixed) // max(per_row, 1)) // 8 * 8)
    tb = min(tb_max, tb_fit, _round_up(B, 8))
    tb = max(8, (tb // 8) * 8)
    # v7x has 2 TensorCores: make sure the "parallel" batch axis has >= 2 tiles to shard.
    if B > 64 and _cdiv(B, tb) < 2:
        tb = max(8, _round_up(_cdiv(B, 2), 8))
    return tb


@functools.partial(jax.jit, static_argnames=("num_classes", "tk", "tb_max"))
def logistic_regression_forward(x, w_padded, b_padded, *, num_classes: int, tk: int,
                                tb_max: int = 512):
    """out = x @ weight.T + bias   (x: [B, D] already flattened, as in inputs.view(B, -1))."""
    B, D = x.shape
    c_pad, d_pad = w_padded.shape

    # K-tiled fallback only: zero-pad the feature dim so every K block is exact.
    # (The weight is already zero-padded to d_pad, but padding x too avoids relying on
    #  out-of-bounds reads being finite.)  Never triggers in the resident-weight path.
    if d_pad != D:
        x = jnp.pad(x, ((0, 0), (0, d_pad - D)))

    tb = _pick_tb(B, tk, c_pad, _dtype_bytes(x.dtype), _dtype_bytes(w_padded.dtype), tb_max)
    grid = (_cdiv(B, tb), d_pad // tk)   # batch raggedness handled by Pallas (no padding of B)

    cost = pl.CostEstimate(
        flops=2 * B * d_pad * c_pad,
        transcendentals=0,
        bytes_accessed=(B * d_pad * _dtype_bytes(x.dtype)
                        + c_pad * d_pad * _dtype_bytes(w_padded.dtype)
                        + B * c_pad * 4),
    )

    out = pl.pallas_call(
        _linear_kernel,
        out_shape=jax.ShapeDtypeStruct((B, c_pad), jnp.float32),
        grid=grid,
        in_specs=[
            pl.BlockSpec((tb, tk), lambda i, k: (i, k)),        # x tile
            pl.BlockSpec((c_pad, tk), lambda i, k: (0, k)),     # weight (resident when tk==D)
            pl.BlockSpec((1, c_pad), lambda i, k: (0, 0)),      # bias (resident)
        ],
        out_specs=pl.BlockSpec((tb, c_pad), lambda i, k: (i, 0)),  # f32 accumulator block
        compiler_params=pltpu.CompilerParams(
            dimension_semantics=("parallel", "arbitrary"),
            vmem_limit_bytes=_VMEM_LIMIT_BYTES,
        ),
        cost_estimate=cost,
    )(x, w_padded, b_padded)

    return out[:, :num_classes]


if __name__ == "__main__":
    # Small shapes consistent with the module: B rows of flattened features (input_size=D),
    # num_classes=C.
    B, D, C = 2, 32, 10

    key = jax.random.PRNGKey(0)
    kx, kw, kb = jax.random.split(key, 3)

    # Deterministic init mimicking nn.Linear's uniform(-1/sqrt(D), 1/sqrt(D)).
    bound = 1.0 / (D ** 0.5)
    weight = jax.random.uniform(kw, (C, D), jnp.float32, minval=-bound, maxval=bound)
    bias = jax.random.uniform(kb, (C,), jnp.float32, minval=-bound, maxval=bound)
    x = jax.random.normal(kx, (B, D), jnp.float32)

    ref = x @ weight.T + bias

    # --- 1) Default f32 path (bit-exact vs. the PyTorch f32 module semantics) -------------
    w_p, b_p, tk = prepare_params(weight, bias)
    out = logistic_regression_forward(x, w_p, b_p, num_classes=C, tk=tk)
    out = jax.block_until_ready(out)
    assert out.shape == (B, C), out.shape
    assert jnp.allclose(out, ref, atol=1e-5, rtol=1e-5), "f32 mismatch vs reference"

    # --- 2) bf16 compute-dtype option (perf path: halves streamed weight bytes; f32 accum) --
    w_p16, b_p16, tk16 = prepare_params(weight, bias, compute_dtype=jnp.bfloat16)
    out16 = logistic_regression_forward(x, w_p16, b_p16, num_classes=C, tk=tk16)
    out16 = jax.block_until_ready(out16)
    assert jnp.allclose(out16, ref, atol=1e-1, rtol=1e-1), "bf16 mismatch vs reference"

    # --- 3) Exercise the K-tiled fallback + ragged batch tile ------------------------------
    B2, D2 = 20, 256
    k2x, k2w, k2b = jax.random.split(jax.random.PRNGKey(1), 3)
    bound2 = 1.0 / (D2 ** 0.5)
    w2 = jax.random.uniform(k2w, (C, D2), jnp.float32, minval=-bound2, maxval=bound2)
    b2 = jax.random.uniform(k2b, (C,), jnp.float32, minval=-bound2, maxval=bound2)
    x2 = jax.random.normal(k2x, (B2, D2), jnp.float32)
    w2_p, b2_p, _ = prepare_params(w2, b2)
    out2 = logistic_regression_forward(x2, w2_p, b2_p, num_classes=C, tk=128)  # force 2 K steps
    out2 = jax.block_until_ready(out2)
    ref2 = x2 @ w2.T + b2
    assert out2.shape == (B2, C), out2.shape
    assert jnp.allclose(out2, ref2, atol=1e-4, rtol=1e-4), "K-tiled mismatch vs reference"

    # TODO(synk): train_model/predict (optimizer loop, CrossEntropyLoss, data loaders) are
    # host-side training utilities, not part of the forward pass, and are not ported.

    print("KERNEL_OK")
</pallas_src>

<mosaic_0001>
module attributes {stable_mosaic.version = 11 : i64} {
  func.func @_linear_kernel(%arg0: i32, %arg1: i32, %arg2: memref<8x32xf32, #tpu.memory_space<vmem>>, %arg3: memref<128x32xf32, #tpu.memory_space<vmem>>, %arg4: memref<1x128xf32, #tpu.memory_space<vmem>>, %arg5: memref<8x128xf32, #tpu.memory_space<vmem>>) attributes {dimension_semantics = [#tpu.dimension_semantics<parallel>, #tpu.dimension_semantics<arbitrary>], iteration_bounds = array<i64: 1, 1>, scalar_prefetch = 0 : i64, scratch_operands = 0 : i64, tpu.core_type = #tpu.core_type<tc>, window_params = [{transform_indices = @transform_0, window_bounds = array<i64: 8, 32>}, {transform_indices = @transform_1, window_bounds = array<i64: 128, 32>}, {pipeline_mode = #tpu.pipeline_mode<synchronous>, transform_indices = @transform_2, window_bounds = array<i64: 1, 128>}, {transform_indices = @transform_3, window_bounds = array<i64: 8, 128>}]} {
    %c0_i32 = arith.constant 0 : i32
    %0 = arith.cmpi eq, %arg1, %c0_i32 : i32
    %1 = arith.extui %0 : i1 to i32
    %c0_i32_0 = arith.constant 0 : i32
    %2 = arith.cmpi ne, %1, %c0_i32_0 : i32
    scf.if %2 {
      %c0_8 = arith.constant 0 : index
      %c0_9 = arith.constant 0 : index
      %9 = vector.load %arg4[%c0_8, %c0_9] : memref<1x128xf32, #tpu.memory_space<vmem>>, vector<1x128xf32>
      %10 = vector.shape_cast %9 : vector<1x128xf32> to vector<1x128xf32>
      %11 = vector.broadcast %10 : vector<1x128xf32> to vector<8x128xf32>
      %c0_10 = arith.constant 0 : index
      %c0_11 = arith.constant 0 : index
      %12 = vector.load %arg5[%c0_10, %c0_11] : memref<8x128xf32, #tpu.memory_space<vmem>>, vector<8x128xf32>
      tpu.vector_store %arg5[%c0_10, %c0_11], %11 {strides = array<i32>} : memref<8x128xf32, #tpu.memory_space<vmem>>, vector<8x128xf32>,
    } else {
    }
    %c0 = arith.constant 0 : index
    %c0_1 = arith.constant 0 : index
    %3 = vector.load %arg2[%c0, %c0_1] : memref<8x32xf32, #tpu.memory_space<vmem>>, vector<8x32xf32>
    %c0_2 = arith.constant 0 : index
    %c0_3 = arith.constant 0 : index
    %4 = vector.load %arg5[%c0_2, %c0_3] : memref<8x128xf32, #tpu.memory_space<vmem>>, vector<8x128xf32>
    %c0_4 = arith.constant 0 : index
    %c0_5 = arith.constant 0 : index
    %5 = vector.load %arg3[%c0_4, %c0_5] : memref<128x32xf32, #tpu.memory_space<vmem>>, vector<128x32xf32>
    %cst = arith.constant dense<0.000000e+00> : vector<8x128xf32>
    %6 = tpu.matmul %3, %5, %cst {dimension_numbers = #tpu.dot_dimension_numbers<[1], [1], [0], [0], [0, 0, 1, 0], [], []>} : vector<8x32xf32>, vector<128x32xf32>, vector<8x128xf32> -> vector<8x128xf32>
    %7 = arith.addf %4, %6 : vector<8x128xf32>
    %c0_6 = arith.constant 0 : index
    %c0_7 = arith.constant 0 : index
    %8 = vector.load %arg5[%c0_6, %c0_7] : memref<8x128xf32, #tpu.memory_space<vmem>>, vector<8x128xf32>
    tpu.vector_store %arg5[%c0_6, %c0_7], %7 {strides = array<i32>} : memref<8x128xf32, #tpu.memory_space<vmem>>, vector<8x128xf32>,
    return
  }
  func.func @transform_0(%arg0: i32, %arg1: i32) -> (i32, i32) {
    %c0_i32 = arith.constant 0 : i32
    return %arg0, %arg1 : i32, i32
  }
  func.func @transform_1(%arg0: i32, %arg1: i32) -> (i32, i32) {
    %c0_i32 = arith.constant 0 : i32
    %c0_i32_0 = arith.constant 0 : i32
    return %c0_i32, %arg1 : i32, i32
  }
  func.func @transform_2(%arg0: i32, %arg1: i32) -> (i32, i32) {
    %c0_i32 = arith.constant 0 : i32
    %c0_i32_0 = arith.constant 0 : i32
    %c0_i32_1 = arith.constant 0 : i32
    return %c0_i32, %c0_i32_0 : i32, i32
  }
  func.func @transform_3(%arg0: i32, %arg1: i32) -> (i32, i32) {
    %c0_i32 = arith.constant 0 : i32
    %c0_i32_0 = arith.constant 0 : i32
    return %arg0, %c0_i32 : i32, i32
  }
}

</mosaic_0001>

<bundles_post_ra>
// kernel: logistic_regression_forward.1
= control target key start
LH: loop header
LB: loop body
LE: loop exit
PB: predicated region body
PF: predicated region fallthrough
CT: control target
= control target key end

     0   :  { %8 = vsyncpa [#allocation3], 0  ;;  %vm45_vm0 = vcmask 261120   ;;  %v282_v1 = vmov 0.0   ;;  %vm283_vm1 = vmmov 0   ;;  %s381_s0 = inlined_call_operand.vmem [shape: f32[2,32], index: 0, kind: input, shape index: {}]   ;;  %s382_s1 = inlined_call_operand.vmem [shape: f32[128,32], index: 1, kind: input, shape index: {}]   ;;  %s383_s2 = inlined_call_operand.vmem [shape: f32[1,128], index: 2, kind: input, shape index: {}]   ;;  %s384_s3 = inlined_call_operand.hbm [shape: f32[2,128], index: 3, kind: output, shape index: {}]  }
   0x1   :  { %v44_v0 = vld [vmem:[%s382_s1 + $0x78] sm:$0xff]  ;;  %220 = vmatprep.subr.mxu0 %v282_v1  ;;  %252 = vmatprep.mubr.msk.f32.mxu0 %vm283_vm1, %v282_v1  ;;  %v43_v2 = vld [vmem:[%s382_s1 + $0x70] sm:$0xff]  ;;  %v42_v3 = vld [vmem:[%s382_s1 + $0x68] sm:$0xff] }
   0x2   :  { %221 = vmatpush3.xpose.msk.msra.mxu0 %vm45_vm0, %v44_v0  ;;  %v41_v4 = vld [vmem:[%s382_s1 + $0x60] sm:$0xff]  ;;  %v40_v5 = vld [vmem:[%s382_s1 + $0x58] sm:$0xff]  ;;  %v39_v6 = vld [vmem:[%s382_s1 + $0x50] sm:$0xff] }
   0x3   :  { %222 = vmatprep.subr.mxu0 %v282_v1  ;;  %v38_v7 = vld [vmem:[%s382_s1 + $0x48] sm:$0xff]  ;;  %v37_v8 = vld [vmem:[%s382_s1 + $0x40] sm:$0xff]  ;;  %v36_v9 = vld [vmem:[%s382_s1 + $0x38] sm:$0xff] }
   0x4   :  { %v35_v10 = vld [vmem:[%s382_s1 + $0x30] sm:$0xff]  ;;  %v34_v11 = vld [vmem:[%s382_s1 + $0x28] sm:$0xff]  ;;  %v33_v12 = vld [vmem:[%s382_s1 + $0x20] sm:$0xff] }
   0x5   :  { %v32_v13 = vld [vmem:[%s382_s1 + $0x18] sm:$0xff]  ;;  %v31_v14 = vld [vmem:[%s382_s1 + $0x10] sm:$0xff]  ;;  %v30_v15 = vld [vmem:[%s382_s1 + $0x8] sm:$0xff] }
   0x6   :  { %223 = vmatpush3.xpose.msk.msra.mxu0 %vm45_vm0, %v43_v2  ;;  %v29_v16 = vld [vmem:[%s382_s1] sm:$0xff] }
   0x7   :  { %224 = vmatprep.subr.mxu0 %v282_v1  ;;  %v27_v17 = vld [vmem:[%s381_s0] sm:$0xff] }
   0x8   :  { %v185_v18 = vld [vmem:[%s383_s2] ss:$0 sm:$0xff] }
   0xa   :  { %225 = vmatpush3.xpose.msk.msra.mxu0 %vm45_vm0, %v42_v3 }
   0xb   :  { %226 = vmatprep.subr.mxu0 %v282_v1 }
   0xe   :  { %227 = vmatpush3.xpose.msk.msra.mxu0 %vm45_vm0, %v41_v4 }
   0xf   :  { %228 = vmatprep.subr.mxu0 %v282_v1 }
  0x12   :  { %229 = vmatpush3.xpose.msk.msra.mxu0 %vm45_vm0, %v40_v5 }
  0x13   :  { %230 = vmatprep.subr.mxu0 %v282_v1 }
  0x16   :  { %231 = vmatpush3.xpose.msk.msra.mxu0 %vm45_vm0, %v39_v6 }
  0x17   :  { %232 = vmatprep.subr.mxu0 %v282_v1 }
  0x1a   :  { %233 = vmatpush3.xpose.msk.msra.mxu0 %vm45_vm0, %v38_v7 }
  0x1b   :  { %234 = vmatprep.subr.mxu0 %v282_v1 }
  0x1e   :  { %235 = vmatpush3.xpose.msk.msra.mxu0 %vm45_vm0, %v37_v8 }
  0x1f   :  { %236 = vmatprep.subr.mxu0 %v282_v1 }
  0x22   :  { %237 = vmatpush3.xpose.msk.msra.mxu0 %vm45_vm0, %v36_v9 }
  0x23   :  { %238 = vmatprep.subr.mxu0 %v282_v1 }
  0x26   :  { %239 = vmatpush3.xpose.msk.msra.mxu0 %vm45_vm0, %v35_v10 }
  0x27   :  { %240 = vmatprep.subr.mxu0 %v282_v1 }
  0x2a   :  { %241 = vmatpush3.xpose.msk.msra.mxu0 %vm45_vm0, %v34_v11 }
  0x2b   :  { %242 = vmatprep.subr.mxu0 %v282_v1 }
  0x2e   :  { %243 = vmatpush3.xpose.msk.msra.mxu0 %vm45_vm0, %v33_v12 }
  0x2f   :  { %244 = vmatprep.subr.mxu0 %v282_v1 }
  0x32   :  { %245 = vmatpush3.xpose.msk.msra.mxu0 %vm45_vm0, %v32_v13 }
  0x33   :  { %246 = vmatprep.subr.mxu0 %v282_v1 }
  0x36   :  { %247 = vmatpush3.xpose.msk.msra.mxu0 %vm45_vm0, %v31_v14 }
  0x37   :  { %248 = vmatprep.subr.mxu0 %v282_v1 }
  0x3a   :  { %249 = vmatpush3.xpose.msk.msra.mxu0 %vm45_vm0, %v30_v15 }
  0x3b   :  { %250 = vmatprep.subr.mxu0 %v282_v1 }
  0x3e   :  { %251 = vmatpush3.xpose.msk.msra.mxu0 %vm45_vm0, %v29_v16 }
  0x41   :  { %253 = vmatmul.mubr.msk.f32.vlgmr.msra.gmra.mxu0 %vm45_vm0, %v27_v17 }
 0x101   :  { %v163_v19 = vpop.f32.mrf.mxu0 }
 0x102   :  { %v167_v20 = vadd.f32 %v185_v18, %v163_v19 }
 0x103   :  { %v254_v21 = vpop.f32.mrf.mxu0 }
 0x104   :  { %168 = vst [vmem:[#allocation2] sm:$0xff] %v167_v20 }
 0x105   :  { %173 = vsyncadd [#allocation3], 96  ;;  %s284_s21 = smov [#allocation2]  }
 0x106   :  { %s174_s22 = sshll.u32 %s284_s21, 4  ;;  %s175_s22 = int_to_ptr.vmem [resolvable:$true] %s174_s22 }
 0x107   :  { %s260_s1 = scalar_lea.vmem %s175_s22, 32  ;;  %s264_s23 = scalar_lea.vmem %s175_s22, 128 }
 0x108   :  { %p261_p0 = scmp.ne.s32.totalorder %s175_s22, %s260_s1  ;;  %p265_p1 = scmp.lt.s32.totalorder %s175_s22, %s175_s22 }
 0x109   :  { %p266_p2 = scmp.lt.s32.totalorder %s264_s23, %s260_s1 }
 0x10b   :  { %p267_p3 = por %p266_p2, %p265_p1 }
 0x10d   :  { %p268_p4 = pnand %p267_p3, %p261_p0 }
 0x10f   :  { %271 = shalt.err (!%p268_p4)
}
 0x110   :  { %s285_s0 = smov 32   ;;  %s286_s24 = smov 2  }
 0x111   :  { %180 = dma.vmem_to_hbm [thread:$0]  %s175_s22, 32, %s384_s3, [#allocation3], %s285_s0, %s285_s0, %s286_s24  }
 0x112   :  { %280 = dma.done.wait [#allocation3], 128  }
 0x113   :  { %281 = vsyncadd [#allocation3], 4294967168 }
 0x114   :  { %184 = vsyncpa [#allocation3], 1 }

</bundles_post_ra>
